<compile_context>
chip_gen: v5e
topology: v5e:2x2
jax: 0.10.0
libtpu: 0.0.40
codegen_flags: <defaults>
</compile_context>

<pallas_src>
import math
import functools

import jax
import jax.numpy as jnp
from jax.experimental import pallas as pl
from jax.experimental.pallas import tpu as pltpu


def _make_pe(max_len: int, d_model: int) -> jnp.ndarray:
    """Deterministic positional-encoding buffer, identical math to the PyTorch __init__."""
    position = jnp.arange(0, max_len, dtype=jnp.float32)[:, None]            # (max_len, 1)
    div_term = jnp.exp(
        jnp.arange(0, d_model, 2, dtype=jnp.float32) * (-math.log(10000.0) / d_model)
    )                                                                         # (d_model/2,)
    ang = position * div_term                                                 # (max_len, d_model/2)
    pe = jnp.zeros((max_len, d_model), dtype=jnp.float32)
    pe = pe.at[:, 0::2].set(jnp.sin(ang))
    pe = pe.at[:, 1::2].set(jnp.cos(ang))
    return pe                                                                 # (max_len, d_model)


# ---- counter-based hash (all int32 ops: wrapping mults, masked shifts) -------------
_HASH_C1 = 0x7FEB352D                    # fits in int32
_HASH_C2 = 0x846CA68B - (1 << 32)        # two's-complement int32 view of 0x846CA68B


def _lsr(z, k):
    # logical right shift for int32: arithmetic shift then mask off the sign fill
    return (z >> k) & jnp.int32((1 << (32 - k)) - 1)


def _hash_i32(z):
    z = z ^ _lsr(z, 16)
    z = z * jnp.int32(_HASH_C1)
    z = z ^ _lsr(z, 15)
    z = z * jnp.int32(_HASH_C2)
    z = z ^ _lsr(z, 16)
    return z


def _pe_dropout_kernel(seed_ref, x_ref, pe_ref, o_ref, *, p: float, training: bool):
    # x_ref / o_ref: (TS, B, D) VMEM tiles; pe_ref: (TS, 1, D); seed_ref: (1,) int32 SMEM.
    ts, b, d = x_ref.shape
    # Sublane-broadcast add across the batch dim (pe read once per seq tile, not per batch).
    y = x_ref[...].astype(jnp.float32) + pe_ref[...]
    if training and p > 0.0:
        # Global element index as the RNG counter (unique & decorrelated across grid tiles).
        row0 = pl.program_id(0) * ts
        s_idx = jax.lax.broadcasted_iota(jnp.int32, (ts, b, d), 0) + row0
        b_idx = jax.lax.broadcasted_iota(jnp.int32, (ts, b, d), 1)
        d_idx = jax.lax.broadcasted_iota(jnp.int32, (ts, b, d), 2)
        ctr = (s_idx * b + b_idx) * d + d_idx + seed_ref[0]
        z = _hash_i32(ctr)
        # keep with prob (1-p): unsigned threshold compare expressed in the signed domain.
        thresh_u = min(max(int(round(p * 2.0 ** 32)), 0), (1 << 32) - 1)
        thresh_s = thresh_u - (1 << 31)
        keep = z >= jnp.int32(thresh_s)
        scale = 1.0 / (1.0 - p)
        # select-of-constants + one multiply (inverted dropout)
        y = y * jnp.where(keep, jnp.float32(scale), jnp.float32(0.0))
        # NOTE: dropout statistics match PyTorch; the exact torch RNG stream cannot match.
    o_ref[...] = y.astype(o_ref.dtype)


def positional_encoding_forward(x, pe_full, *, p=0.1, training=True, seed=0, block_rows=None):
    """x: (seq, batch, d_model).  Returns dropout(x + pe[:seq]) with inverted scaling."""
    S, B, D = x.shape
    pe3 = pe_full[:S, :].astype(jnp.float32)[:, None, :]                      # (S, 1, D)

    itemsize = jnp.dtype(x.dtype).itemsize
    if block_rows is None:
        bytes_per_row = B * D * itemsize
        target_bytes = 2 * 1024 * 1024                      # ~2 MiB x-tile
        rows = max(8, (target_bytes // max(bytes_per_row, 1)) // 8 * 8)
        block_rows = int(min(S, rows))
    grid = (pl.cdiv(S, block_rows),)

    tile_bytes = block_rows * B * D * itemsize
    # x-in + out double-buffered (+ small pe tiles); capped so it fits v7x's 64 MiB VMEM.
    vmem_limit = int(min(48 * 2 ** 20, max(16 * 2 ** 20, 8 * tile_bytes)))

    seed_arr = jnp.asarray([seed], dtype=jnp.int32)
    kernel = functools.partial(_pe_dropout_kernel, p=float(p), training=bool(training))

    out = pl.pallas_call(
        kernel,
        out_shape=jax.ShapeDtypeStruct((S, B, D), x.dtype),
        grid=grid,
        in_specs=[
            pl.BlockSpec(memory_space=pltpu.MemorySpace.SMEM),                # seed scalar
            pl.BlockSpec((block_rows, B, D), lambda i: (i, 0, 0)),            # x tile
            pl.BlockSpec((block_rows, 1, D), lambda i: (i, 0, 0)),            # pe tile (no batch tiling)
        ],
        out_specs=pl.BlockSpec((block_rows, B, D), lambda i: (i, 0, 0)),
        compiler_params=pltpu.CompilerParams(
            dimension_semantics=("parallel",),   # lets v7x shard seq tiles across both TCs
            vmem_limit_bytes=vmem_limit,
        ),
        # input_output_aliases={1: 0} could alias x -> out to drop the extra HBM buffer
        # (left off so the caller's x stays live).
    )(seed_arr, x, pe3)
    return out


if __name__ == "__main__":
    d_model = 32
    max_len = 64          # small synthetic max_len (module default is 5000)
    seq_len = 8
    batch = 2
    p = 0.1

    key = jax.random.PRNGKey(0)
    x = jax.random.normal(key, (seq_len, batch, d_model), dtype=jnp.float32)
    pe_full = _make_pe(max_len, d_model)
    ref = x + pe_full[:seq_len][:, None, :]

    # Training-mode forward (add + inverted dropout p=0.1).
    out_train = positional_encoding_forward(x, pe_full, p=p, training=True, seed=1234)
    out_train = jax.block_until_ready(out_train)
    assert out_train.shape == (seq_len, batch, d_model)
    scaled = ref / (1.0 - p)
    ok = jnp.all((out_train == 0.0) | jnp.isclose(out_train, scaled, rtol=1e-5, atol=1e-6))
    assert bool(ok), "training-mode output not consistent with inverted dropout of (x + pe)"

    # Eval-mode forward (dropout is identity) -> must equal plain-JAX reference.
    out_eval = positional_encoding_forward(x, pe_full, p=p, training=False)
    out_eval = jax.block_until_ready(out_eval)
    assert jnp.allclose(out_eval, ref, atol=1e-6), "eval-mode mismatch vs reference"

    # Exercise a multi-tile grid (3 sequence tiles of 8 rows each).
    seq2 = 24
    x_b = jax.random.normal(jax.random.PRNGKey(1), (seq2, batch, d_model), dtype=jnp.float32)
    ref_b = x_b + pe_full[:seq2][:, None, :]
    out_b_eval = positional_encoding_forward(x_b, pe_full, p=p, training=False, block_rows=8)
    out_b_eval = jax.block_until_ready(out_b_eval)
    assert jnp.allclose(out_b_eval, ref_b, atol=1e-6), "gridded eval-mode mismatch"
    out_b_train = positional_encoding_forward(x_b, pe_full, p=p, training=True, seed=7, block_rows=8)
    out_b_train = jax.block_until_ready(out_b_train)
    ok_b = jnp.all((out_b_train == 0.0)
                   | jnp.isclose(out_b_train, ref_b / (1.0 - p), rtol=1e-5, atol=1e-6))
    assert bool(ok_b), "gridded training-mode output inconsistent with inverted dropout"

    # Ragged grid (seq not a multiple of block_rows) — Pallas masks the partial last tile.
    seq3 = 20
    x_c = jax.random.normal(jax.random.PRNGKey(2), (seq3, batch, d_model), dtype=jnp.float32)
    ref_c = x_c + pe_full[:seq3][:, None, :]
    out_c = positional_encoding_forward(x_c, pe_full, p=p, training=False, block_rows=8)
    out_c = jax.block_until_ready(out_c)
    assert jnp.allclose(out_c, ref_c, atol=1e-6), "ragged-grid eval-mode mismatch"

    print("KERNEL_OK")
</pallas_src>

<mosaic_0001>
module attributes {stable_mosaic.version = 11 : i64} {
  func.func @_pe_dropout_kernel(%arg0: i32, %arg1: memref<1xi32, #tpu.memory_space<smem>>, %arg2: memref<8x2x32xf32, #tpu.memory_space<vmem>>, %arg3: memref<8x1x32xf32, #tpu.memory_space<vmem>>, %arg4: memref<8x2x32xf32, #tpu.memory_space<vmem>>) attributes {dimension_semantics = [#tpu.dimension_semantics<parallel>], iteration_bounds = array<i64: 1>, scalar_prefetch = 0 : i64, scratch_operands = 0 : i64, tpu.core_type = #tpu.core_type<tc>, window_params = [{transform_indices = @transform_0, window_bounds = array<i64: 1>}, {transform_indices = @transform_1, window_bounds = array<i64: 8, 2, 32>}, {transform_indices = @transform_2, window_bounds = array<i64: 8, 1, 32>}, {transform_indices = @transform_3, window_bounds = array<i64: 8, 2, 32>}]} {
    %c0 = arith.constant 0 : index
    %c0_0 = arith.constant 0 : index
    %c0_1 = arith.constant 0 : index
    %0 = vector.load %arg2[%c0, %c0_0, %c0_1] : memref<8x2x32xf32, #tpu.memory_space<vmem>>, vector<8x2x32xf32>
    %c0_2 = arith.constant 0 : index
    %c0_3 = arith.constant 0 : index
    %c0_4 = arith.constant 0 : index
    %1 = vector.load %arg3[%c0_2, %c0_3, %c0_4] : memref<8x1x32xf32, #tpu.memory_space<vmem>>, vector<8x1x32xf32>
    %2 = vector.broadcast %1 : vector<8x1x32xf32> to vector<8x2x32xf32>
    %3 = arith.addf %0, %2 : vector<8x2x32xf32>
    %c8_i32 = arith.constant 8 : i32
    %4 = arith.muli %arg0, %c8_i32 : i32
    %5 = tpu.iota {dimensions = array<i32: 0>} : vector<8x2x32xi32>
    %6 = vector.broadcast %4 : i32 to vector<8x2x32xi32>
    %7 = arith.addi %5, %6 : vector<8x2x32xi32>
    %8 = tpu.iota {dimensions = array<i32: 1>} : vector<8x2x32xi32>
    %9 = tpu.iota {dimensions = array<i32: 2>} : vector<8x2x32xi32>
    %c2_i32 = arith.constant 2 : i32
    %10 = vector.broadcast %c2_i32 : i32 to vector<8x2x32xi32>
    %11 = arith.muli %7, %10 : vector<8x2x32xi32>
    %12 = arith.addi %11, %8 : vector<8x2x32xi32>
    %c32_i32 = arith.constant 32 : i32
    %13 = vector.broadcast %c32_i32 : i32 to vector<8x2x32xi32>
    %14 = arith.muli %12, %13 : vector<8x2x32xi32>
    %15 = arith.addi %14, %9 : vector<8x2x32xi32>
    %c0_5 = arith.constant 0 : index
    %16 = memref.load %arg1[%c0_5] : memref<1xi32, #tpu.memory_space<smem>>
    %17 = vector.broadcast %16 : i32 to vector<8x2x32xi32>
    %18 = arith.addi %15, %17 : vector<8x2x32xi32>
    %c16_i32 = arith.constant 16 : i32
    %19 = vector.broadcast %c16_i32 : i32 to vector<8x2x32xi32>
    %20 = arith.shrsi %18, %19 : vector<8x2x32xi32>
    %c65535_i32 = arith.constant 65535 : i32
    %21 = vector.broadcast %c65535_i32 : i32 to vector<8x2x32xi32>
    %22 = arith.andi %20, %21 : vector<8x2x32xi32>
    %23 = arith.xori %18, %22 : vector<8x2x32xi32>
    %c2146121005_i32 = arith.constant 2146121005 : i32
    %24 = vector.broadcast %c2146121005_i32 : i32 to vector<8x2x32xi32>
    %25 = arith.muli %23, %24 : vector<8x2x32xi32>
    %c15_i32 = arith.constant 15 : i32
    %26 = vector.broadcast %c15_i32 : i32 to vector<8x2x32xi32>
    %27 = arith.shrsi %25, %26 : vector<8x2x32xi32>
    %c131071_i32 = arith.constant 131071 : i32
    %28 = vector.broadcast %c131071_i32 : i32 to vector<8x2x32xi32>
    %29 = arith.andi %27, %28 : vector<8x2x32xi32>
    %30 = arith.xori %25, %29 : vector<8x2x32xi32>
    %c-2073254261_i32 = arith.constant -2073254261 : i32
    %31 = vector.broadcast %c-2073254261_i32 : i32 to vector<8x2x32xi32>
    %32 = arith.muli %30, %31 : vector<8x2x32xi32>
    %c16_i32_6 = arith.constant 16 : i32
    %33 = vector.broadcast %c16_i32_6 : i32 to vector<8x2x32xi32>
    %34 = arith.shrsi %32, %33 : vector<8x2x32xi32>
    %c65535_i32_7 = arith.constant 65535 : i32
    %35 = vector.broadcast %c65535_i32_7 : i32 to vector<8x2x32xi32>
    %36 = arith.andi %34, %35 : vector<8x2x32xi32>
    %37 = arith.xori %32, %36 : vector<8x2x32xi32>
    %c-1717986918_i32 = arith.constant -1717986918 : i32
    %38 = vector.broadcast %c-1717986918_i32 : i32 to vector<8x2x32xi32>
    %39 = arith.cmpi sge, %37, %38 : vector<8x2x32xi32>
    %cst = arith.constant 1.11111116 : f32
    %cst_8 = arith.constant 0.000000e+00 : f32
    %40 = vector.broadcast %cst : f32 to vector<8x2x32xf32>
    %41 = vector.broadcast %cst_8 : f32 to vector<8x2x32xf32>
    %42 = arith.select %39, %40, %41 : vector<8x2x32xi1>, vector<8x2x32xf32>
    %43 = arith.mulf %3, %42 : vector<8x2x32xf32>
    %c0_9 = arith.constant 0 : index
    %c0_10 = arith.constant 0 : index
    %c0_11 = arith.constant 0 : index
    %44 = vector.load %arg4[%c0_9, %c0_10, %c0_11] : memref<8x2x32xf32, #tpu.memory_space<vmem>>, vector<8x2x32xf32>
    tpu.vector_store %arg4[%c0_9, %c0_10, %c0_11], %43 {strides = array<i32>} : memref<8x2x32xf32, #tpu.memory_space<vmem>>, vector<8x2x32xf32>,
    return
  }
  func.func @transform_0(%arg0: i32) -> i32 {
    %c0_i32 = arith.constant 0 : i32
    %c0_i32_0 = arith.constant 0 : i32
    return %c0_i32 : i32
  }
  func.func @transform_1(%arg0: i32) -> (i32, i32, i32) {
    %c0_i32 = arith.constant 0 : i32
    %c0_i32_0 = arith.constant 0 : i32
    %c0_i32_1 = arith.constant 0 : i32
    return %arg0, %c0_i32, %c0_i32_0 : i32, i32, i32
  }
  func.func @transform_2(%arg0: i32) -> (i32, i32, i32) {
    %c0_i32 = arith.constant 0 : i32
    %c0_i32_0 = arith.constant 0 : i32
    %c0_i32_1 = arith.constant 0 : i32
    return %arg0, %c0_i32, %c0_i32_0 : i32, i32, i32
  }
  func.func @transform_3(%arg0: i32) -> (i32, i32, i32) {
    %c0_i32 = arith.constant 0 : i32
    %c0_i32_0 = arith.constant 0 : i32
    %c0_i32_1 = arith.constant 0 : i32
    return %arg0, %c0_i32, %c0_i32_0 : i32, i32, i32
  }
}

</mosaic_0001>

<bundles_post_ra>
// kernel: tpu_custom_call.1
= control target key start
LH: loop header
LB: loop body
LE: loop exit
PB: predicated region body
PF: predicated region fallthrough
CT: control target
= control target key end

     0   :  { %9 = vsyncpa [#allocation4], 0  ;;  %s492_s0 = inlined_call_operand.<no memory space> [shape: s32[1], index: 0, kind: input, shape index: {}]   ;;  %s493_s1 = inlined_call_operand.hbm [shape: f32[8,2,32], index: 1, kind: input, shape index: {}]   ;;  %s494_s2 = inlined_call_operand.hbm [shape: f32[8,1,32], index: 2, kind: input, shape index: {}]   ;;  %s495_s3 = inlined_call_operand.hbm [shape: f32[8,2,32], index: 3, kind: output, shape index: {}]  }
   0x1   :  { %10 = vsyncpa [#allocation7], 0 }
   0x2   :  { %11 = vsyncpa [#allocation5], 0  ;;  %s18_s14 = sshll.u32 %s493_s1, 4  ;;  %s410_s15 = smov [#allocation3]   ;;  %s19_s14 = int_to_ptr.hbm [resolvable:$true] %s18_s14 }
   0x3   :  { %s20_s16 = sshll.u32 %s410_s15, 4  ;;  %s31_s19 = sshll.u32 %s494_s2, 4  ;;  %s21_s16 = int_to_ptr.vmem [resolvable:$true] %s20_s16  ;;  %s32_s19 = int_to_ptr.hbm [resolvable:$true] %s31_s19 }
   0x4   :  { %s411_s20 = smov 32   ;;  %s412_s21 = smov 2  }
   0x5   :  { %26 = dma.hbm_to_vmem [thread:$0]  %s19_s14, 256, %s21_s16, [#allocation4], %s411_s20, %s411_s20, %s412_s21  }
   0x6   :  { %s413_s22 = smov [#allocation6]   ;;  %s414_s24 = smov 16  }
   0x7   :  { %s33_s23 = sshll.u32 %s413_s22, 4  ;;  %s415_s1 = smov 1   ;;  %s34_s23 = int_to_ptr.vmem [resolvable:$true] %s33_s23 }
   0x8   :  { %39 = dma.hbm_to_vmem [thread:$0]  %s32_s19, 128, %s34_s23, [#allocation7], %s414_s24, %s414_s24, %s415_s1  }
   0x9   :  { %404 = dma.done.wait [#allocation4], 256  }
   0xa   :  { %405 = vsyncadd [#allocation4], 4294967040 }
   0xb   :  { %406 = dma.done.wait [#allocation7], 128  }
   0xc   :  { %407 = vsyncadd [#allocation7], 4294967168  ;;  %v105_v0 = vlaneseq  ;;  %v452_v7 = vstv %s492_s0  ;;  %v324_v19 = vld [vmem:[#allocation6] ss:$0 sm:$0xff]  ;;  %v48_v24 = vld [vmem:[#allocation3] sm:$0x3] }
   0xd   :  { %v49_v25 = vld [vmem:[#allocation3 + $0x2] sm:$0x3]  ;;  %v325_v28 = vld [vmem:[#allocation6 + $0x1] ss:$0 sm:$0xff]  ;;  %v326_v32 = vld [vmem:[#allocation6 + $0x2] ss:$0 sm:$0xff]  ;;  %v88_v35 = vadd.f32 %v324_v19, %v48_v24 }
   0xe   :  { %v106_v1 = vshrl.u32 %v105_v0, 7  ;;  %v447_v2 = vand.u32 127, %v105_v0  ;;  %v50_v38 = vld [vmem:[#allocation3 + $0x4] sm:$0x3]  ;;  %v89_v45 = vadd.f32 %v325_v28, %v49_v25  ;;  %v327_v49 = vld [vmem:[#allocation6 + $0x3] ss:$0 sm:$0xff] }
   0xf   :  { %v90_v48 = vadd.f32 %v326_v32, %v50_v38  ;;  %v51_v56 = vld [vmem:[#allocation3 + $0x6] sm:$0x3]  ;;  %vm263_vm0 = vcmask 254976   ;;  %v328_v32 = vld [vmem:[#allocation6 + $0x4] ss:$0 sm:$0xff]  ;;  %s417_s0 = smov [#allocation8]  }
  0x10   :  { %v125_v3 = vmul.u32 32, %v106_v1  ;;  %v118_v4 = vadd.s32 2, %v106_v1  ;;  %v119_v5 = vadd.s32 4, %v106_v1  ;;  %v120_v6 = vadd.s32 6, %v106_v1  ;;  %s276_s26 = sshll.u32 %s417_s0, 4  ;;  %s278_s29 = sshll.u32 %s495_s3, 4  ;;  %s277_s26 = int_to_ptr.vmem [resolvable:$true] %s276_s26  ;;  %s279_s29 = int_to_ptr.hbm [resolvable:$true] %s278_s29 }
  0x11   :  { %v121_v12 = vadd.s32 8, %v106_v1  ;;  %v122_v17 = vadd.s32 10, %v106_v1  ;;  %v123_v18 = vadd.s32 12, %v106_v1  ;;  %v124_v23 = vadd.s32 14, %v106_v1 }
  0x12   :  { %v133_v8 = vadd.s32 %v125_v3, %v447_v2  ;;  %v126_v9 = vmul.u32 32, %v118_v4  ;;  %v127_v10 = vmul.u32 32, %v119_v5  ;;  %v128_v11 = vmul.u32 32, %v120_v6 }
  0x13   :  { %v129_v31 = vmul.u32 32, %v121_v12  ;;  %v130_v34 = vmul.u32 32, %v122_v17  ;;  %v131_v43 = vmul.u32 32, %v123_v18  ;;  %v132_v61 = vmul.u32 32, %v124_v23 }
  0x14   :  { %v143_v13 = vadd.s32 %v452_v7, %v133_v8  ;;  %v134_v14 = vadd.s32 %v126_v9, %v447_v2  ;;  %v135_v15 = vadd.s32 %v127_v10, %v447_v2  ;;  %v136_v16 = vadd.s32 %v128_v11, %v447_v2 }
  0x15   :  { %v137_v41 = vadd.s32 %v129_v31, %v447_v2  ;;  %v138_v42 = vadd.s32 %v130_v34, %v447_v2  ;;  %v139_v57 = vadd.s32 %v131_v43, %v447_v2  ;;  %v91_v3 = vadd.f32 %v327_v49, %v51_v56 }
  0x16   :  { %v292_v20 = vshrl.u32 %v143_v13, 16  ;;  %v144_v21 = vadd.s32 %v452_v7, %v134_v14  ;;  %v145_v22 = vadd.s32 %v452_v7, %v135_v15  ;;  %v146_v26 = vadd.s32 %v452_v7, %v136_v16 }
  0x17   :  { %v147_v51 = vadd.s32 %v452_v7, %v137_v41  ;;  %v148_v52 = vadd.s32 %v452_v7, %v138_v42  ;;  %v149_v1 = vadd.s32 %v452_v7, %v139_v57  ;;  %v140_v15 = vadd.s32 %v132_v61, %v447_v2  ;;  %v53_v42 = vld [vmem:[#allocation3 + $0xa] sm:$0x3] }
  0x18   :  { %v167_v27 = vxor.u32 %v292_v20, %v143_v13  ;;  %v293_v29 = vshrl.u32 %v144_v21, 16  ;;  %v294_v30 = vshrl.u32 %v145_v22, 16  ;;  %v295_v33 = vshrl.u32 %v146_v26, 16 }
  0x19   :  { %v296_v59 = vshrl.u32 %v147_v51, 16  ;;  %v297_v60 = vshrl.u32 %v148_v52, 16  ;;  %v298_v11 = vshrl.u32 %v149_v1, 16  ;;  %v150_v23 = vadd.s32 %v452_v7, %v140_v15  ;;  %v52_v7 = vld [vmem:[#allocation3 + $0x8] sm:$0x3] }
  0x1a   :  { %v175_v36 = vmul.u32 2146121005, %v167_v27  ;;  %v168_v37 = vxor.u32 %v293_v29, %v144_v21  ;;  %v169_v39 = vxor.u32 %v294_v30, %v145_v22  ;;  %v170_v40 = vxor.u32 %v295_v33, %v146_v26 }
  0x1b   :  { %v171_v5 = vxor.u32 %v296_v59, %v147_v51  ;;  %v172_v6 = vxor.u32 %v297_v60, %v148_v52  ;;  %v173_v19 = vxor.u32 %v298_v11, %v149_v1  ;;  %v416_v27 = vmov 0.0  }
  0x1c   :  { %v300_v44 = vshrl.u32 %v175_v36, 15  ;;  %v176_v46 = vmul.u32 2146121005, %v168_v37  ;;  %v177_v47 = vmul.u32 2146121005, %v169_v39 }
  0x1d   :  { %v178_v50 = vmul.u32 2146121005, %v170_v40  ;;  %v179_v13 = vmul.u32 2146121005, %v171_v5  ;;  %v180_v14 = vmul.u32 2146121005, %v172_v6 }
  0x1e   :  { %v199_v53 = vxor.u32 %v300_v44, %v175_v36  ;;  %v301_v54 = vshrl.u32 %v176_v46, 15  ;;  %v302_v55 = vshrl.u32 %v177_v47, 15  ;;  %v181_v26 = vmul.u32 2146121005, %v173_v19  ;;  %v329_v37 = vld [vmem:[#allocation6 + $0x5] ss:$0 sm:$0xff] }
  0x1f   :  { %v303_v58 = vshrl.u32 %v178_v50, 15  ;;  %v304_v21 = vshrl.u32 %v179_v13, 15  ;;  %v305_v22 = vshrl.u32 %v180_v14, 15  ;;  %v54_v44 = vld [vmem:[#allocation3 + $0xc] sm:$0x3] }
  0x20   :  { %v207_v62 = vmul.u32 2221713035, %v199_v53  ;;  %v200_v63 = vxor.u32 %v301_v54, %v176_v46  ;;  %v201_v0 = vxor.u32 %v302_v55, %v177_v47  ;;  %v306_v33 = vshrl.u32 %v181_v26, 15  ;;  %v331_v5 = vld [vmem:[#allocation6 + $0x7] ss:$0 sm:$0xff] }
  0x21   :  { %v202_v4 = vxor.u32 %v303_v58, %v178_v50  ;;  %v203_v30 = vxor.u32 %v304_v21, %v179_v13  ;;  %v204_v31 = vxor.u32 %v305_v22, %v180_v14  ;;  %v299_v47 = vshrl.u32 %v150_v23, 16  ;;  %v330_v50 = vld [vmem:[#allocation6 + $0x6] ss:$0 sm:$0xff] }
  0x22   :  { %v308_v8 = vshrl.u32 %v207_v62, 16  ;;  %v208_v9 = vmul.u32 2221713035, %v200_v63  ;;  %v209_v10 = vmul.u32 2221713035, %v201_v0  ;;  %v205_v46 = vxor.u32 %v306_v33, %v181_v26 }
  0x23   :  { %v210_v12 = vmul.u32 2221713035, %v202_v4  ;;  %v211_v41 = vmul.u32 2221713035, %v203_v30  ;;  %v212_v43 = vmul.u32 2221713035, %v204_v31  ;;  %v174_v53 = vxor.u32 %v299_v47, %v150_v23 }
  0x24   :  { %v231_v16 = vxor.u32 %v308_v8, %v207_v62  ;;  %v309_v17 = vshrl.u32 %v208_v9, 16  ;;  %v310_v18 = vshrl.u32 %v209_v10, 16  ;;  %v213_v52 = vmul.u32 2221713035, %v205_v46  ;;  %v55_v8 = vld [vmem:[#allocation3 + $0xe] sm:$0x3] }
  0x25   :  { %v311_v20 = vshrl.u32 %v210_v12, 16  ;;  %v312_v49 = vshrl.u32 %v211_v41, 16  ;;  %v313_v51 = vshrl.u32 %v212_v43, 16  ;;  %v93_v54 = vadd.f32 %v329_v37, %v53_v42 }
  0x26   :  { %vm239_vm1 = vcmp.ge.s32.totalorder %v231_v16, 2576980378  ;;  %v232_v24 = vxor.u32 %v309_v17, %v208_v9  ;;  %v233_v25 = vxor.u32 %v310_v18, %v209_v10  ;;  %v314_v56 = vshrl.u32 %v213_v52, 16 }
  0x27   :  { %v247_v28 = vsel %vm239_vm1, 1.1111112, %v416_v27  ;;  %v234_v29 = vxor.u32 %v311_v20, %v210_v12  ;;  %v236_v55 = vxor.u32 %v313_v51, %v212_v43  ;;  %v182_v57 = vmul.u32 2146121005, %v174_v53 }
  0x28   :  { %v255_v2 = vmul.f32 %v247_v28, %v88_v35  ;;  %vm240_vm2 = vcmp.ge.s32.totalorder %v232_v24, 2576980378  ;;  %vm241_vm3 = vcmp.ge.s32.totalorder %v233_v25, 2576980378  ;;  %v94_v58 = vadd.f32 %v330_v50, %v54_v44 }
  0x29   :  { %v248_v34 = vsel %vm240_vm2, 1.1111112, %v416_v27  ;;  %v249_v36 = vsel %vm241_vm3, 1.1111112, %v416_v27  ;;  %vm242_vm4 = vcmp.ge.s32.totalorder %v234_v29, 2576980378  ;;  %v237_v60 = vxor.u32 %v314_v56, %v213_v52 }
  0x2a   :  { %264 = vst.msk [vmem:[#allocation8] sm:$0x3] %vm263_vm0, %v255_v2  ;;  %v256_v38 = vmul.f32 %v248_v34, %v89_v45  ;;  %v257_v39 = vmul.f32 %v249_v36, %v90_v48  ;;  %v250_v40 = vsel %vm242_vm4, 1.1111112, %v416_v27  ;;  %v92_v45 = vadd.f32 %v328_v32, %v52_v7 }
  0x2b   :  { %v258_v35 = vmul.f32 %v250_v40, %v91_v3  ;;  %v235_v48 = vxor.u32 %v312_v49, %v211_v41  ;;  %vm244_vm6 = vcmp.ge.s32.totalorder %v236_v55, 2576980378  ;;  %v307_v61 = vshrl.u32 %v182_v57, 15 }
  0x2c   :  { %265 = vst.msk [vmem:[#allocation8 + $0x2] sm:$0x3] %vm263_vm0, %v256_v38  ;;  %v252_v63 = vsel %vm244_vm6, 1.1111112, %v416_v27  ;;  %vm245_vm7 = vcmp.ge.s32.totalorder %v237_v60, 2576980378  ;;  %v95_v10 = vadd.f32 %v331_v5, %v55_v8 }
  0x2d   :  { %266 = vst.msk [vmem:[#allocation8 + $0x4] sm:$0x3] %vm263_vm0, %v257_v39  ;;  %vm243_vm5 = vcmp.ge.s32.totalorder %v235_v48, 2576980378  ;;  %v260_v0 = vmul.f32 %v252_v63, %v93_v54  ;;  %v206_v1 = vxor.u32 %v307_v61, %v182_v57  ;;  %v253_v3 = vsel %vm245_vm7, 1.1111112, %v416_v27 }
  0x2e   :  { %267 = vst.msk [vmem:[#allocation8 + $0x6] sm:$0x3] %vm263_vm0, %v258_v35  ;;  %v251_v59 = vsel %vm243_vm5, 1.1111112, %v416_v27  ;;  %v261_v4 = vmul.f32 %v253_v3, %v94_v58 }
  0x2f   :  { %v259_v62 = vmul.f32 %v251_v59, %v92_v45  ;;  %269 = vst.msk [vmem:[#allocation8 + $0xa] sm:$0x3] %vm263_vm0, %v260_v0  ;;  %v214_v6 = vmul.u32 2221713035, %v206_v1 }
  0x30   :  { %270 = vst.msk [vmem:[#allocation8 + $0xc] sm:$0x3] %vm263_vm0, %v261_v4 }
  0x31   :  { %268 = vst.msk [vmem:[#allocation8 + $0x8] sm:$0x3] %vm263_vm0, %v259_v62  ;;  %v315_v9 = vshrl.u32 %v214_v6, 16 }
  0x33   :  { %v238_v11 = vxor.u32 %v315_v9, %v214_v6 }
  0x35   :  { %vm246_vm8 = vcmp.ge.s32.totalorder %v238_v11, 2576980378 }
  0x36   :  { %v254_v12 = vsel %vm246_vm8, 1.1111112, %v416_v27 }
  0x37   :  { %v262_v13 = vmul.f32 %v254_v12, %v95_v10 }
  0x39   :  { %271 = vst.msk [vmem:[#allocation8 + $0xe] sm:$0x3] %vm263_vm0, %v262_v13 }
  0x3a   :  { %284 = dma.vmem_to_hbm [thread:$0]  %s277_s26, 256, %s279_s29, [#allocation5], %s411_s20, %s411_s20, %s412_s21  }
  0x3b   :  { %408 = dma.done.wait [#allocation5], 256  }
  0x3c   :  { %409 = vsyncadd [#allocation5], 4294967040 }
  0x3d   :  { %289 = vsyncpa [#allocation4], 1 }
  0x3e   :  { %290 = vsyncpa [#allocation7], 1 }
  0x3f   :  { %291 = vsyncpa [#allocation5], 1 }

</bundles_post_ra>
